<compile_context>
chip_gen: v5e
topology: v5e:2x2
jax: 0.10.0
libtpu: 0.0.40
codegen_flags: <defaults>
</compile_context>

<pallas_src>
import functools

import jax
import jax.numpy as jnp
from jax.experimental import pallas as pl
from jax.experimental.pallas import tpu as pltpu

_EPS = 1e-5


def _poincare_dist_kernel(s_ref, o_ref, out_ref):
    """Poincare distance, transposed layout.

    s_ref:   (D, T)       source columns (one per batch element, de-duplicated)
    o_ref:   (K-1, D, T)  "other" columns
    out_ref: (K-1, T)     distances (lane-dense)
    """
    km1 = o_ref.shape[0]
    s = s_ref[...]                                               # (D, T) f32
    sq_s = jnp.sum(s * s, axis=0, keepdims=True)                 # (1, T)  sublane reduce
    alpha = jnp.maximum(1.0 - sq_s, _EPS)                        # (1, T)

    # K-1 is small and static: unrolled Python loop over the "other" slots.
    for k in range(km1):
        o = o_ref[k]                                             # (D, T)
        diff = o - s
        sqdist = jnp.sum(diff * diff, axis=0, keepdims=True)     # (1, T)
        sq_o = jnp.sum(o * o, axis=0, keepdims=True)             # (1, T)
        beta = jnp.maximum(1.0 - sq_o, _EPS)                     # (1, T)

        # x = gamma - 1 = 2*||u-v||^2 / ((1-||u||^2)(1-||v||^2));
        # approximate reciprocal lands on the EUP slot (nearly free).
        x = 2.0 * sqdist * pl.reciprocal(alpha * beta, approx=True)
        x = jnp.maximum(x, _EPS)
        # arccosh(1 + x) = log(1 + x + sqrt(x*(x+2)))  (no gamma^2-1 cancellation)
        out_ref[pl.ds(k, 1), :] = jnp.log(1.0 + x + jnp.sqrt(x * (x + 2.0)))


def _round_up(x, m):
    return ((x + m - 1) // m) * m


def _choose_lane_tile(batch, km1, d, max_tile=2048, vmem_budget=8 * 1024 * 1024):
    """Lane tile: multiple of 128, as large as is useful.

    Grow while (a) the batch still leaves >= 4 grid steps (keeps both v7x
    TensorCores fed) and (b) the double-buffered VMEM footprint stays well
    under the 32 MiB scoped default (64 MiB physical on v7x)."""
    bytes_per_col = 4 * (km1 * d + d + km1)            # o + s + out columns, f32
    tile = 128
    while tile < max_tile:
        nxt = tile * 2
        fits_vmem = 2 * bytes_per_col * nxt <= vmem_budget   # double-buffered
        enough_steps = batch >= nxt * 4
        if fits_vmem and enough_steps:
            tile = nxt
        else:
            break
    return tile


def _poincare_pallas(s_t, o_t, lane_tile):
    """s_t: (D, Bp), o_t: (K-1, D, Bp) -> (K-1, Bp) distances."""
    km1, d, bp = o_t.shape
    return pl.pallas_call(
        _poincare_dist_kernel,
        out_shape=jax.ShapeDtypeStruct((km1, bp), jnp.float32),
        grid=(bp // lane_tile,),
        in_specs=[
            # source fetched once per batch tile (no K-1 duplication in HBM)
            pl.BlockSpec((d, lane_tile), lambda i: (0, i)),
            pl.BlockSpec((km1, d, lane_tile), lambda i: (0, 0, i)),
        ],
        out_specs=pl.BlockSpec((km1, lane_tile), lambda i: (0, i)),
        compiler_params=pltpu.CompilerParams(
            dimension_semantics=("parallel",),
            vmem_limit_bytes=32 * 1024 * 1024,
        ),
    )(s_t, o_t)


@jax.jit
def model_forward(weight, inputs):
    """Pallas-backed equivalent of Model.forward (Poincare manifold).

    weight: (n, dim) f32 embedding table.
    inputs: (B, K) int32 indices; column 0 is the source node.
    returns: (B, K-1) f32 distances.
    """
    weight = weight.astype(jnp.float32)
    # TODO(synk): the embedding gather could be fused into the kernel via
    # PrefetchScalarGridSpec scalar-prefetched indices (or manual DMA gather)
    # to avoid the HBM round trip of the gathered activations.
    e = jnp.take(weight, inputs, axis=0)                  # (B, K, D)
    b, k, d = e.shape
    km1 = k - 1
    if km1 == 0:
        return jnp.zeros((b, 0), jnp.float32)

    # Transposed, lane-dense layout: batch on the last (lane) axis.
    s_t = jnp.transpose(e[:, 0, :], (1, 0))               # (D, B)     source (no broadcast)
    o_t = jnp.transpose(e[:, 1:, :], (1, 2, 0))           # (K-1, D, B)

    lane_tile = _choose_lane_tile(b, km1, d)
    bp = _round_up(b, lane_tile)
    if bp != b:
        s_t = jnp.pad(s_t, ((0, 0), (0, bp - b)))
        o_t = jnp.pad(o_t, ((0, 0), (0, 0), (0, bp - b)))

    dist_t = _poincare_pallas(s_t, o_t, lane_tile)        # (K-1, Bp)
    return dist_t[:, :b].T                                # (B, K-1) == dist.squeeze(-1)


def _reference_forward(weight, inputs):
    """Pure-JAX reference (same clamped formulation, exact divide)."""
    e = jnp.take(weight.astype(jnp.float32), inputs, axis=0)
    o = e[:, 1:, :]
    s = e[:, 0:1, :]
    sqdist = jnp.sum((s - o) ** 2, axis=-1)
    alpha = jnp.maximum(1.0 - jnp.sum(s * s, axis=-1), _EPS)
    beta = jnp.maximum(1.0 - jnp.sum(o * o, axis=-1), _EPS)
    x = jnp.maximum(2.0 * sqdist / (alpha * beta), _EPS)
    return jnp.log(1.0 + x + jnp.sqrt(x * (x + 2.0)))


if __name__ == "__main__":
    n, dim = 100, 32       # embedding table size / dimension
    B, K = 2, 8            # batch of index rows; first index is the source node

    key = jax.random.PRNGKey(0)
    k_w, k_i = jax.random.split(key)

    # Deterministic init: small uniform ball (standard Poincare-embedding init).
    weight = jax.random.uniform(k_w, (n, dim), jnp.float32, -1e-3, 1e-3)
    inputs = jax.random.randint(k_i, (B, K), 0, n, dtype=jnp.int32)

    out = jax.block_until_ready(model_forward(weight, inputs))
    ref = _reference_forward(weight, inputs)

    assert out.shape == (B, K - 1), out.shape
    # Tolerance accounts for pl.reciprocal(approx=True) on the EUP (rel err ~1e-4).
    assert jnp.allclose(out, ref, atol=1e-4, rtol=1e-4), (out, ref)

    print("KERNEL_OK")
</pallas_src>

<mosaic_0001>
module attributes {stable_mosaic.version = 11 : i64} {
  func.func @_poincare_dist_kernel(%arg0: i32, %arg1: memref<32x128xf32, #tpu.memory_space<vmem>>, %arg2: memref<7x32x128xf32, #tpu.memory_space<vmem>>, %arg3: memref<7x128xf32, #tpu.memory_space<vmem>>) attributes {dimension_semantics = [#tpu.dimension_semantics<parallel>], iteration_bounds = array<i64: 1>, scalar_prefetch = 0 : i64, scratch_operands = 0 : i64, tpu.core_type = #tpu.core_type<tc>, window_params = [{transform_indices = @transform_0, window_bounds = array<i64: 32, 128>}, {transform_indices = @transform_1, window_bounds = array<i64: 7, 32, 128>}, {transform_indices = @transform_2, window_bounds = array<i64: 7, 128>}]} {
    %c0 = arith.constant 0 : index
    %c0_0 = arith.constant 0 : index
    %0 = vector.load %arg1[%c0, %c0_0] : memref<32x128xf32, #tpu.memory_space<vmem>>, vector<32x128xf32>
    %1 = arith.mulf %0, %0 : vector<32x128xf32>
    %cst = arith.constant dense<0.000000e+00> : vector<128xf32>
    %2 = vector.multi_reduction <add>, %1, %cst [0] : vector<32x128xf32> to vector<128xf32>
    %3 = vector.shape_cast %2 : vector<128xf32> to vector<1x128xf32>
    %cst_1 = arith.constant 1.000000e+00 : f32
    %4 = vector.broadcast %cst_1 : f32 to vector<1x128xf32>
    %5 = arith.subf %4, %3 : vector<1x128xf32>
    %cst_2 = arith.constant 9.99999974E-6 : f32
    %6 = vector.broadcast %cst_2 : f32 to vector<1x128xf32>
    %7 = arith.maximumf %5, %6 : vector<1x128xf32>
    %c0_3 = arith.constant 0 : index
    %c0_4 = arith.constant 0 : index
    %c0_5 = arith.constant 0 : index
    %8 = vector.load %arg2[%c0_3, %c0_4, %c0_5] : memref<7x32x128xf32, #tpu.memory_space<vmem>>, vector<1x32x128xf32>
    %9 = vector.shape_cast %8 : vector<1x32x128xf32> to vector<32x128xf32>
    %10 = arith.subf %9, %0 : vector<32x128xf32>
    %11 = arith.mulf %10, %10 : vector<32x128xf32>
    %cst_6 = arith.constant dense<0.000000e+00> : vector<128xf32>
    %12 = vector.multi_reduction <add>, %11, %cst_6 [0] : vector<32x128xf32> to vector<128xf32>
    %13 = vector.shape_cast %12 : vector<128xf32> to vector<1x128xf32>
    %14 = arith.mulf %9, %9 : vector<32x128xf32>
    %cst_7 = arith.constant dense<0.000000e+00> : vector<128xf32>
    %15 = vector.multi_reduction <add>, %14, %cst_7 [0] : vector<32x128xf32> to vector<128xf32>
    %16 = vector.shape_cast %15 : vector<128xf32> to vector<1x128xf32>
    %cst_8 = arith.constant 1.000000e+00 : f32
    %17 = vector.broadcast %cst_8 : f32 to vector<1x128xf32>
    %18 = arith.subf %17, %16 : vector<1x128xf32>
    %cst_9 = arith.constant 9.99999974E-6 : f32
    %19 = vector.broadcast %cst_9 : f32 to vector<1x128xf32>
    %20 = arith.maximumf %18, %19 : vector<1x128xf32>
    %cst_10 = arith.constant 2.000000e+00 : f32
    %21 = vector.broadcast %cst_10 : f32 to vector<1x128xf32>
    %22 = arith.mulf %21, %13 : vector<1x128xf32>
    %23 = arith.mulf %7, %20 : vector<1x128xf32>
    %24 = tpu.reciprocal %23 {approx = true} : vector<1x128xf32> -> vector<1x128xf32>
    %25 = arith.mulf %22, %24 : vector<1x128xf32>
    %cst_11 = arith.constant 9.99999974E-6 : f32
    %26 = vector.broadcast %cst_11 : f32 to vector<1x128xf32>
    %27 = arith.maximumf %25, %26 : vector<1x128xf32>
    %cst_12 = arith.constant 1.000000e+00 : f32
    %28 = vector.broadcast %cst_12 : f32 to vector<1x128xf32>
    %29 = arith.addf %28, %27 : vector<1x128xf32>
    %cst_13 = arith.constant 2.000000e+00 : f32
    %30 = vector.broadcast %cst_13 : f32 to vector<1x128xf32>
    %31 = arith.addf %27, %30 : vector<1x128xf32>
    %32 = arith.mulf %27, %31 : vector<1x128xf32>
    %33 = math.sqrt %32 : vector<1x128xf32>
    %34 = arith.addf %29, %33 : vector<1x128xf32>
    %35 = math.log %34 : vector<1x128xf32>
    %c0_14 = arith.constant 0 : index
    %c0_15 = arith.constant 0 : index
    %36 = vector.load %arg3[%c0_14, %c0_15] : memref<7x128xf32, #tpu.memory_space<vmem>>, vector<1x128xf32>
    tpu.vector_store %arg3[%c0_14, %c0_15], %35 {strides = array<i32>} : memref<7x128xf32, #tpu.memory_space<vmem>>, vector<1x128xf32>,
    %c1 = arith.constant 1 : index
    %c0_16 = arith.constant 0 : index
    %c0_17 = arith.constant 0 : index
    %37 = vector.load %arg2[%c1, %c0_16, %c0_17] : memref<7x32x128xf32, #tpu.memory_space<vmem>>, vector<1x32x128xf32>
    %38 = vector.shape_cast %37 : vector<1x32x128xf32> to vector<32x128xf32>
    %39 = arith.subf %38, %0 : vector<32x128xf32>
    %40 = arith.mulf %39, %39 : vector<32x128xf32>
    %cst_18 = arith.constant dense<0.000000e+00> : vector<128xf32>
    %41 = vector.multi_reduction <add>, %40, %cst_18 [0] : vector<32x128xf32> to vector<128xf32>
    %42 = vector.shape_cast %41 : vector<128xf32> to vector<1x128xf32>
    %43 = arith.mulf %38, %38 : vector<32x128xf32>
    %cst_19 = arith.constant dense<0.000000e+00> : vector<128xf32>
    %44 = vector.multi_reduction <add>, %43, %cst_19 [0] : vector<32x128xf32> to vector<128xf32>
    %45 = vector.shape_cast %44 : vector<128xf32> to vector<1x128xf32>
    %cst_20 = arith.constant 1.000000e+00 : f32
    %46 = vector.broadcast %cst_20 : f32 to vector<1x128xf32>
    %47 = arith.subf %46, %45 : vector<1x128xf32>
    %cst_21 = arith.constant 9.99999974E-6 : f32
    %48 = vector.broadcast %cst_21 : f32 to vector<1x128xf32>
    %49 = arith.maximumf %47, %48 : vector<1x128xf32>
    %cst_22 = arith.constant 2.000000e+00 : f32
    %50 = vector.broadcast %cst_22 : f32 to vector<1x128xf32>
    %51 = arith.mulf %50, %42 : vector<1x128xf32>
    %52 = arith.mulf %7, %49 : vector<1x128xf32>
    %53 = tpu.reciprocal %52 {approx = true} : vector<1x128xf32> -> vector<1x128xf32>
    %54 = arith.mulf %51, %53 : vector<1x128xf32>
    %cst_23 = arith.constant 9.99999974E-6 : f32
    %55 = vector.broadcast %cst_23 : f32 to vector<1x128xf32>
    %56 = arith.maximumf %54, %55 : vector<1x128xf32>
    %cst_24 = arith.constant 1.000000e+00 : f32
    %57 = vector.broadcast %cst_24 : f32 to vector<1x128xf32>
    %58 = arith.addf %57, %56 : vector<1x128xf32>
    %cst_25 = arith.constant 2.000000e+00 : f32
    %59 = vector.broadcast %cst_25 : f32 to vector<1x128xf32>
    %60 = arith.addf %56, %59 : vector<1x128xf32>
    %61 = arith.mulf %56, %60 : vector<1x128xf32>
    %62 = math.sqrt %61 : vector<1x128xf32>
    %63 = arith.addf %58, %62 : vector<1x128xf32>
    %64 = math.log %63 : vector<1x128xf32>
    %c1_26 = arith.constant 1 : index
    %c0_27 = arith.constant 0 : index
    %65 = vector.load %arg3[%c1_26, %c0_27] : memref<7x128xf32, #tpu.memory_space<vmem>>, vector<1x128xf32>
    tpu.vector_store %arg3[%c1_26, %c0_27], %64 {strides = array<i32>} : memref<7x128xf32, #tpu.memory_space<vmem>>, vector<1x128xf32>,
    %c2 = arith.constant 2 : index
    %c0_28 = arith.constant 0 : index
    %c0_29 = arith.constant 0 : index
    %66 = vector.load %arg2[%c2, %c0_28, %c0_29] : memref<7x32x128xf32, #tpu.memory_space<vmem>>, vector<1x32x128xf32>
    %67 = vector.shape_cast %66 : vector<1x32x128xf32> to vector<32x128xf32>
    %68 = arith.subf %67, %0 : vector<32x128xf32>
    %69 = arith.mulf %68, %68 : vector<32x128xf32>
    %cst_30 = arith.constant dense<0.000000e+00> : vector<128xf32>
    %70 = vector.multi_reduction <add>, %69, %cst_30 [0] : vector<32x128xf32> to vector<128xf32>
    %71 = vector.shape_cast %70 : vector<128xf32> to vector<1x128xf32>
    %72 = arith.mulf %67, %67 : vector<32x128xf32>
    %cst_31 = arith.constant dense<0.000000e+00> : vector<128xf32>
    %73 = vector.multi_reduction <add>, %72, %cst_31 [0] : vector<32x128xf32> to vector<128xf32>
    %74 = vector.shape_cast %73 : vector<128xf32> to vector<1x128xf32>
    %cst_32 = arith.constant 1.000000e+00 : f32
    %75 = vector.broadcast %cst_32 : f32 to vector<1x128xf32>
    %76 = arith.subf %75, %74 : vector<1x128xf32>
    %cst_33 = arith.constant 9.99999974E-6 : f32
    %77 = vector.broadcast %cst_33 : f32 to vector<1x128xf32>
    %78 = arith.maximumf %76, %77 : vector<1x128xf32>
    %cst_34 = arith.constant 2.000000e+00 : f32
    %79 = vector.broadcast %cst_34 : f32 to vector<1x128xf32>
    %80 = arith.mulf %79, %71 : vector<1x128xf32>
    %81 = arith.mulf %7, %78 : vector<1x128xf32>
    %82 = tpu.reciprocal %81 {approx = true} : vector<1x128xf32> -> vector<1x128xf32>
    %83 = arith.mulf %80, %82 : vector<1x128xf32>
    %cst_35 = arith.constant 9.99999974E-6 : f32
    %84 = vector.broadcast %cst_35 : f32 to vector<1x128xf32>
    %85 = arith.maximumf %83, %84 : vector<1x128xf32>
    %cst_36 = arith.constant 1.000000e+00 : f32
    %86 = vector.broadcast %cst_36 : f32 to vector<1x128xf32>
    %87 = arith.addf %86, %85 : vector<1x128xf32>
    %cst_37 = arith.constant 2.000000e+00 : f32
    %88 = vector.broadcast %cst_37 : f32 to vector<1x128xf32>
    %89 = arith.addf %85, %88 : vector<1x128xf32>
    %90 = arith.mulf %85, %89 : vector<1x128xf32>
    %91 = math.sqrt %90 : vector<1x128xf32>
    %92 = arith.addf %87, %91 : vector<1x128xf32>
    %93 = math.log %92 : vector<1x128xf32>
    %c2_38 = arith.constant 2 : index
    %c0_39 = arith.constant 0 : index
    %94 = vector.load %arg3[%c2_38, %c0_39] : memref<7x128xf32, #tpu.memory_space<vmem>>, vector<1x128xf32>
    tpu.vector_store %arg3[%c2_38, %c0_39], %93 {strides = array<i32>} : memref<7x128xf32, #tpu.memory_space<vmem>>, vector<1x128xf32>,
    %c3 = arith.constant 3 : index
    %c0_40 = arith.constant 0 : index
    %c0_41 = arith.constant 0 : index
    %95 = vector.load %arg2[%c3, %c0_40, %c0_41] : memref<7x32x128xf32, #tpu.memory_space<vmem>>, vector<1x32x128xf32>
    %96 = vector.shape_cast %95 : vector<1x32x128xf32> to vector<32x128xf32>
    %97 = arith.subf %96, %0 : vector<32x128xf32>
    %98 = arith.mulf %97, %97 : vector<32x128xf32>
    %cst_42 = arith.constant dense<0.000000e+00> : vector<128xf32>
    %99 = vector.multi_reduction <add>, %98, %cst_42 [0] : vector<32x128xf32> to vector<128xf32>
    %100 = vector.shape_cast %99 : vector<128xf32> to vector<1x128xf32>
    %101 = arith.mulf %96, %96 : vector<32x128xf32>
    %cst_43 = arith.constant dense<0.000000e+00> : vector<128xf32>
    %102 = vector.multi_reduction <add>, %101, %cst_43 [0] : vector<32x128xf32> to vector<128xf32>
    %103 = vector.shape_cast %102 : vector<128xf32> to vector<1x128xf32>
    %cst_44 = arith.constant 1.000000e+00 : f32
    %104 = vector.broadcast %cst_44 : f32 to vector<1x128xf32>
    %105 = arith.subf %104, %103 : vector<1x128xf32>
    %cst_45 = arith.constant 9.99999974E-6 : f32
    %106 = vector.broadcast %cst_45 : f32 to vector<1x128xf32>
    %107 = arith.maximumf %105, %106 : vector<1x128xf32>
    %cst_46 = arith.constant 2.000000e+00 : f32
    %108 = vector.broadcast %cst_46 : f32 to vector<1x128xf32>
    %109 = arith.mulf %108, %100 : vector<1x128xf32>
    %110 = arith.mulf %7, %107 : vector<1x128xf32>
    %111 = tpu.reciprocal %110 {approx = true} : vector<1x128xf32> -> vector<1x128xf32>
    %112 = arith.mulf %109, %111 : vector<1x128xf32>
    %cst_47 = arith.constant 9.99999974E-6 : f32
    %113 = vector.broadcast %cst_47 : f32 to vector<1x128xf32>
    %114 = arith.maximumf %112, %113 : vector<1x128xf32>
    %cst_48 = arith.constant 1.000000e+00 : f32
    %115 = vector.broadcast %cst_48 : f32 to vector<1x128xf32>
    %116 = arith.addf %115, %114 : vector<1x128xf32>
    %cst_49 = arith.constant 2.000000e+00 : f32
    %117 = vector.broadcast %cst_49 : f32 to vector<1x128xf32>
    %118 = arith.addf %114, %117 : vector<1x128xf32>
    %119 = arith.mulf %114, %118 : vector<1x128xf32>
    %120 = math.sqrt %119 : vector<1x128xf32>
    %121 = arith.addf %116, %120 : vector<1x128xf32>
    %122 = math.log %121 : vector<1x128xf32>
    %c3_50 = arith.constant 3 : index
    %c0_51 = arith.constant 0 : index
    %123 = vector.load %arg3[%c3_50, %c0_51] : memref<7x128xf32, #tpu.memory_space<vmem>>, vector<1x128xf32>
    tpu.vector_store %arg3[%c3_50, %c0_51], %122 {strides = array<i32>} : memref<7x128xf32, #tpu.memory_space<vmem>>, vector<1x128xf32>,
    %c4 = arith.constant 4 : index
    %c0_52 = arith.constant 0 : index
    %c0_53 = arith.constant 0 : index
    %124 = vector.load %arg2[%c4, %c0_52, %c0_53] : memref<7x32x128xf32, #tpu.memory_space<vmem>>, vector<1x32x128xf32>
    %125 = vector.shape_cast %124 : vector<1x32x128xf32> to vector<32x128xf32>
    %126 = arith.subf %125, %0 : vector<32x128xf32>
    %127 = arith.mulf %126, %126 : vector<32x128xf32>
    %cst_54 = arith.constant dense<0.000000e+00> : vector<128xf32>
    %128 = vector.multi_reduction <add>, %127, %cst_54 [0] : vector<32x128xf32> to vector<128xf32>
    %129 = vector.shape_cast %128 : vector<128xf32> to vector<1x128xf32>
    %130 = arith.mulf %125, %125 : vector<32x128xf32>
    %cst_55 = arith.constant dense<0.000000e+00> : vector<128xf32>
    %131 = vector.multi_reduction <add>, %130, %cst_55 [0] : vector<32x128xf32> to vector<128xf32>
    %132 = vector.shape_cast %131 : vector<128xf32> to vector<1x128xf32>
    %cst_56 = arith.constant 1.000000e+00 : f32
    %133 = vector.broadcast %cst_56 : f32 to vector<1x128xf32>
    %134 = arith.subf %133, %132 : vector<1x128xf32>
    %cst_57 = arith.constant 9.99999974E-6 : f32
    %135 = vector.broadcast %cst_57 : f32 to vector<1x128xf32>
    %136 = arith.maximumf %134, %135 : vector<1x128xf32>
    %cst_58 = arith.constant 2.000000e+00 : f32
    %137 = vector.broadcast %cst_58 : f32 to vector<1x128xf32>
    %138 = arith.mulf %137, %129 : vector<1x128xf32>
    %139 = arith.mulf %7, %136 : vector<1x128xf32>
    %140 = tpu.reciprocal %139 {approx = true} : vector<1x128xf32> -> vector<1x128xf32>
    %141 = arith.mulf %138, %140 : vector<1x128xf32>
    %cst_59 = arith.constant 9.99999974E-6 : f32
    %142 = vector.broadcast %cst_59 : f32 to vector<1x128xf32>
    %143 = arith.maximumf %141, %142 : vector<1x128xf32>
    %cst_60 = arith.constant 1.000000e+00 : f32
    %144 = vector.broadcast %cst_60 : f32 to vector<1x128xf32>
    %145 = arith.addf %144, %143 : vector<1x128xf32>
    %cst_61 = arith.constant 2.000000e+00 : f32
    %146 = vector.broadcast %cst_61 : f32 to vector<1x128xf32>
    %147 = arith.addf %143, %146 : vector<1x128xf32>
    %148 = arith.mulf %143, %147 : vector<1x128xf32>
    %149 = math.sqrt %148 : vector<1x128xf32>
    %150 = arith.addf %145, %149 : vector<1x128xf32>
    %151 = math.log %150 : vector<1x128xf32>
    %c4_62 = arith.constant 4 : index
    %c0_63 = arith.constant 0 : index
    %152 = vector.load %arg3[%c4_62, %c0_63] : memref<7x128xf32, #tpu.memory_space<vmem>>, vector<1x128xf32>
    tpu.vector_store %arg3[%c4_62, %c0_63], %151 {strides = array<i32>} : memref<7x128xf32, #tpu.memory_space<vmem>>, vector<1x128xf32>,
    %c5 = arith.constant 5 : index
    %c0_64 = arith.constant 0 : index
    %c0_65 = arith.constant 0 : index
    %153 = vector.load %arg2[%c5, %c0_64, %c0_65] : memref<7x32x128xf32, #tpu.memory_space<vmem>>, vector<1x32x128xf32>
    %154 = vector.shape_cast %153 : vector<1x32x128xf32> to vector<32x128xf32>
    %155 = arith.subf %154, %0 : vector<32x128xf32>
    %156 = arith.mulf %155, %155 : vector<32x128xf32>
    %cst_66 = arith.constant dense<0.000000e+00> : vector<128xf32>
    %157 = vector.multi_reduction <add>, %156, %cst_66 [0] : vector<32x128xf32> to vector<128xf32>
    %158 = vector.shape_cast %157 : vector<128xf32> to vector<1x128xf32>
    %159 = arith.mulf %154, %154 : vector<32x128xf32>
    %cst_67 = arith.constant dense<0.000000e+00> : vector<128xf32>
    %160 = vector.multi_reduction <add>, %159, %cst_67 [0] : vector<32x128xf32> to vector<128xf32>
    %161 = vector.shape_cast %160 : vector<128xf32> to vector<1x128xf32>
    %cst_68 = arith.constant 1.000000e+00 : f32
    %162 = vector.broadcast %cst_68 : f32 to vector<1x128xf32>
    %163 = arith.subf %162, %161 : vector<1x128xf32>
    %cst_69 = arith.constant 9.99999974E-6 : f32
    %164 = vector.broadcast %cst_69 : f32 to vector<1x128xf32>
    %165 = arith.maximumf %163, %164 : vector<1x128xf32>
    %cst_70 = arith.constant 2.000000e+00 : f32
    %166 = vector.broadcast %cst_70 : f32 to vector<1x128xf32>
    %167 = arith.mulf %166, %158 : vector<1x128xf32>
    %168 = arith.mulf %7, %165 : vector<1x128xf32>
    %169 = tpu.reciprocal %168 {approx = true} : vector<1x128xf32> -> vector<1x128xf32>
    %170 = arith.mulf %167, %169 : vector<1x128xf32>
    %cst_71 = arith.constant 9.99999974E-6 : f32
    %171 = vector.broadcast %cst_71 : f32 to vector<1x128xf32>
    %172 = arith.maximumf %170, %171 : vector<1x128xf32>
    %cst_72 = arith.constant 1.000000e+00 : f32
    %173 = vector.broadcast %cst_72 : f32 to vector<1x128xf32>
    %174 = arith.addf %173, %172 : vector<1x128xf32>
    %cst_73 = arith.constant 2.000000e+00 : f32
    %175 = vector.broadcast %cst_73 : f32 to vector<1x128xf32>
    %176 = arith.addf %172, %175 : vector<1x128xf32>
    %177 = arith.mulf %172, %176 : vector<1x128xf32>
    %178 = math.sqrt %177 : vector<1x128xf32>
    %179 = arith.addf %174, %178 : vector<1x128xf32>
    %180 = math.log %179 : vector<1x128xf32>
    %c5_74 = arith.constant 5 : index
    %c0_75 = arith.constant 0 : index
    %181 = vector.load %arg3[%c5_74, %c0_75] : memref<7x128xf32, #tpu.memory_space<vmem>>, vector<1x128xf32>
    tpu.vector_store %arg3[%c5_74, %c0_75], %180 {strides = array<i32>} : memref<7x128xf32, #tpu.memory_space<vmem>>, vector<1x128xf32>,
    %c6 = arith.constant 6 : index
    %c0_76 = arith.constant 0 : index
    %c0_77 = arith.constant 0 : index
    %182 = vector.load %arg2[%c6, %c0_76, %c0_77] : memref<7x32x128xf32, #tpu.memory_space<vmem>>, vector<1x32x128xf32>
    %183 = vector.shape_cast %182 : vector<1x32x128xf32> to vector<32x128xf32>
    %184 = arith.subf %183, %0 : vector<32x128xf32>
    %185 = arith.mulf %184, %184 : vector<32x128xf32>
    %cst_78 = arith.constant dense<0.000000e+00> : vector<128xf32>
    %186 = vector.multi_reduction <add>, %185, %cst_78 [0] : vector<32x128xf32> to vector<128xf32>
    %187 = vector.shape_cast %186 : vector<128xf32> to vector<1x128xf32>
    %188 = arith.mulf %183, %183 : vector<32x128xf32>
    %cst_79 = arith.constant dense<0.000000e+00> : vector<128xf32>
    %189 = vector.multi_reduction <add>, %188, %cst_79 [0] : vector<32x128xf32> to vector<128xf32>
    %190 = vector.shape_cast %189 : vector<128xf32> to vector<1x128xf32>
    %cst_80 = arith.constant 1.000000e+00 : f32
    %191 = vector.broadcast %cst_80 : f32 to vector<1x128xf32>
    %192 = arith.subf %191, %190 : vector<1x128xf32>
    %cst_81 = arith.constant 9.99999974E-6 : f32
    %193 = vector.broadcast %cst_81 : f32 to vector<1x128xf32>
    %194 = arith.maximumf %192, %193 : vector<1x128xf32>
    %cst_82 = arith.constant 2.000000e+00 : f32
    %195 = vector.broadcast %cst_82 : f32 to vector<1x128xf32>
    %196 = arith.mulf %195, %187 : vector<1x128xf32>
    %197 = arith.mulf %7, %194 : vector<1x128xf32>
    %198 = tpu.reciprocal %197 {approx = true} : vector<1x128xf32> -> vector<1x128xf32>
    %199 = arith.mulf %196, %198 : vector<1x128xf32>
    %cst_83 = arith.constant 9.99999974E-6 : f32
    %200 = vector.broadcast %cst_83 : f32 to vector<1x128xf32>
    %201 = arith.maximumf %199, %200 : vector<1x128xf32>
    %cst_84 = arith.constant 1.000000e+00 : f32
    %202 = vector.broadcast %cst_84 : f32 to vector<1x128xf32>
    %203 = arith.addf %202, %201 : vector<1x128xf32>
    %cst_85 = arith.constant 2.000000e+00 : f32
    %204 = vector.broadcast %cst_85 : f32 to vector<1x128xf32>
    %205 = arith.addf %201, %204 : vector<1x128xf32>
    %206 = arith.mulf %201, %205 : vector<1x128xf32>
    %207 = math.sqrt %206 : vector<1x128xf32>
    %208 = arith.addf %203, %207 : vector<1x128xf32>
    %209 = math.log %208 : vector<1x128xf32>
    %c6_86 = arith.constant 6 : index
    %c0_87 = arith.constant 0 : index
    %210 = vector.load %arg3[%c6_86, %c0_87] : memref<7x128xf32, #tpu.memory_space<vmem>>, vector<1x128xf32>
    tpu.vector_store %arg3[%c6_86, %c0_87], %209 {strides = array<i32>} : memref<7x128xf32, #tpu.memory_space<vmem>>, vector<1x128xf32>,
    return
  }
  func.func @transform_0(%arg0: i32) -> (i32, i32) {
    %c0_i32 = arith.constant 0 : i32
    %c0_i32_0 = arith.constant 0 : i32
    return %c0_i32, %arg0 : i32, i32
  }
  func.func @transform_1(%arg0: i32) -> (i32, i32, i32) {
    %c0_i32 = arith.constant 0 : i32
    %c0_i32_0 = arith.constant 0 : i32
    %c0_i32_1 = arith.constant 0 : i32
    return %c0_i32, %c0_i32_0, %arg0 : i32, i32, i32
  }
  func.func @transform_2(%arg0: i32) -> (i32, i32) {
    %c0_i32 = arith.constant 0 : i32
    %c0_i32_0 = arith.constant 0 : i32
    return %c0_i32, %arg0 : i32, i32
  }
}

</mosaic_0001>

<bundles_post_ra>
// kernel: model_forward.1
= control target key start
LH: loop header
LB: loop body
LE: loop exit
PB: predicated region body
PF: predicated region fallthrough
CT: control target
= control target key end

     0   :  { %s773_s0 = inlined_call_operand.vmem [shape: f32[32,128], index: 0, kind: input, shape index: {}]   ;;  %s774_s1 = inlined_call_operand.vmem [shape: f32[7,32,128], index: 1, kind: input, shape index: {}]   ;;  %s775_s2 = inlined_call_operand.vmem [shape: f32[7,128], index: 2, kind: output, shape index: {}]  }
   0x1   :  { %v544_v0 = vld [vmem:[%s773_s0] sm:$0xff]  ;;  %v549_v1 = vld [vmem:[%s773_s0 + $0x8] sm:$0xff]  ;;  %v554_v2 = vld [vmem:[%s773_s0 + $0x10] sm:$0xff] }
   0x2   :  { %v559_v3 = vld [vmem:[%s773_s0 + $0x18] sm:$0xff]  ;;  %v15_v4 = vmul.f32 %v544_v0, %v544_v0  ;;  %v16_v5 = vmul.f32 %v549_v1, %v549_v1  ;;  %v17_v6 = vmul.f32 %v554_v2, %v554_v2  ;;  %v30_v7 = vld [vmem:[%s774_s1] sm:$0xff]  ;;  %v31_v8 = vld [vmem:[%s774_s1 + $0x8] sm:$0xff] }
   0x3   :  { %v18_v9 = vmul.f32 %v559_v3, %v559_v3  ;;  %v32_v10 = vld [vmem:[%s774_s1 + $0x10] sm:$0xff]  ;;  %v33_v11 = vld [vmem:[%s774_s1 + $0x18] sm:$0xff]  ;;  %v34_v12 = vsub.f32 %v30_v7, %v544_v0  ;;  %v35_v13 = vsub.f32 %v31_v8, %v549_v1  ;;  %v51_v14 = vmul.f32 %v30_v7, %v30_v7  ;;  %v460_v23 = vld [vmem:[%s774_s1 + $0x20] sm:$0xff] }
   0x4   :  { %v19_v15 = vadd.f32 %v16_v5, %v15_v4  ;;  %v36_v16 = vsub.f32 %v32_v10, %v554_v2  ;;  %v37_v17 = vsub.f32 %v33_v11, %v559_v3  ;;  %v52_v18 = vmul.f32 %v31_v8, %v31_v8  ;;  %v461_v28 = vld [vmem:[%s774_s1 + $0x28] sm:$0xff]  ;;  %v462_v29 = vld [vmem:[%s774_s1 + $0x30] sm:$0xff]  ;;  %v463_v31 = vld [vmem:[%s774_s1 + $0x38] sm:$0xff] }
   0x5   :  { %v38_v19 = vmul.f32 %v34_v12, %v34_v12  ;;  %v39_v20 = vmul.f32 %v35_v13, %v35_v13  ;;  %v53_v21 = vmul.f32 %v32_v10, %v32_v10  ;;  %v54_v22 = vmul.f32 %v33_v11, %v33_v11  ;;  %v464_v51 = vld [vmem:[%s774_s1 + $0x40] sm:$0xff]  ;;  %v465_v55 = vld [vmem:[%s774_s1 + $0x48] sm:$0xff]  ;;  %v466_v56 = vld [vmem:[%s774_s1 + $0x50] sm:$0xff] }
   0x6   :  { %v20_v24 = vadd.f32 %v19_v15, %v17_v6  ;;  %v40_v25 = vmul.f32 %v36_v16, %v36_v16  ;;  %v41_v26 = vmul.f32 %v37_v17, %v37_v17  ;;  %v55_v27 = vadd.f32 %v52_v18, %v51_v14  ;;  %v467_v60 = vld [vmem:[%s774_s1 + $0x58] sm:$0xff] }
   0x7   :  { %v42_v30 = vadd.f32 %v39_v20, %v38_v19  ;;  %v95_v32 = vsub.f32 %v460_v23, %v544_v0  ;;  %v96_v33 = vsub.f32 %v461_v28, %v549_v1  ;;  %v97_v34 = vsub.f32 %v462_v29, %v554_v2 }
   0x8   :  { %v21_v35 = vadd.f32 %v20_v24, %v18_v9  ;;  %v56_v36 = vadd.f32 %v55_v27, %v53_v21  ;;  %v98_v37 = vsub.f32 %v463_v31, %v559_v3  ;;  %v112_v38 = vmul.f32 %v460_v23, %v460_v23 }
   0x9   :  { %v43_v39 = vadd.f32 %v42_v30, %v40_v25  ;;  %v99_v40 = vmul.f32 %v95_v32, %v95_v32  ;;  %v100_v41 = vmul.f32 %v96_v33, %v96_v33  ;;  %v101_v42 = vmul.f32 %v97_v34, %v97_v34 }
   0xa   :  { %v22_v43 = vrot.slane %v21_v35, 4  ;;  %v57_v44 = vadd.f32 %v56_v36, %v54_v22  ;;  %v102_v45 = vmul.f32 %v98_v37, %v98_v37  ;;  %v113_v46 = vmul.f32 %v461_v28, %v461_v28 }
   0xb   :  { %v44_v47 = vadd.f32 %v43_v39, %v41_v26  ;;  %v103_v48 = vadd.f32 %v100_v41, %v99_v40  ;;  %v114_v49 = vmul.f32 %v462_v29, %v462_v29  ;;  %v115_v50 = vmul.f32 %v463_v31, %v463_v31  ;;  %v468_v39 = vld [vmem:[%s774_s1 + $0x60] sm:$0xff] }
   0xc   :  { %v23_v52 = vadd.f32 %v22_v43, %v21_v35  ;;  %v58_v53 = vrot.slane %v57_v44, 4  ;;  %v116_v54 = vadd.f32 %v113_v46, %v112_v38  ;;  %v156_v57 = vsub.f32 %v464_v51, %v544_v0 }
   0xd   :  { %v45_v58 = vrot.slane %v44_v47, 4  ;;  %v104_v59 = vadd.f32 %v103_v48, %v101_v42  ;;  %v157_v61 = vsub.f32 %v465_v55, %v549_v1  ;;  %v158_v62 = vsub.f32 %v466_v56, %v554_v2 }
   0xe   :  { %v24_v63 = vrot.slane %v23_v52, 2  ;;  %v59_v4 = vadd.f32 %v58_v53, %v57_v44  ;;  %v117_v5 = vadd.f32 %v116_v54, %v114_v49  ;;  %v159_v6 = vsub.f32 %v467_v60, %v559_v3 }
   0xf   :  { %v46_v7 = vadd.f32 %v45_v58, %v44_v47  ;;  %v105_v8 = vadd.f32 %v104_v59, %v102_v45  ;;  %v160_v9 = vmul.f32 %v156_v57, %v156_v57  ;;  %v161_v10 = vmul.f32 %v157_v61, %v157_v61  ;;  %v469_v47 = vld [vmem:[%s774_s1 + $0x68] sm:$0xff] }
  0x10   :  { %v25_v11 = vadd.f32 %v24_v63, %v23_v52  ;;  %v60_v12 = vrot.slane %v59_v4, 2  ;;  %v118_v13 = vadd.f32 %v117_v5, %v115_v50  ;;  %v162_v14 = vmul.f32 %v158_v62, %v158_v62  ;;  %v470_v50 = vld [vmem:[%s774_s1 + $0x70] sm:$0xff] }
  0x11   :  { %v47_v15 = vrot.slane %v46_v7, 2  ;;  %v106_v16 = vrot.slane %v105_v8, 4  ;;  %v163_v17 = vmul.f32 %v159_v6, %v159_v6  ;;  %v164_v18 = vadd.f32 %v161_v10, %v160_v9 }
  0x12   :  { %v26_v19 = vrot.slane %v25_v11, 1  ;;  %v61_v20 = vadd.f32 %v60_v12, %v59_v4  ;;  %v119_v21 = vrot.slane %v118_v13, 4  ;;  %v173_v22 = vmul.f32 %v464_v51, %v464_v51 }
  0x13   :  { %v48_v23 = vadd.f32 %v47_v15, %v46_v7  ;;  %v107_v24 = vadd.f32 %v106_v16, %v105_v8  ;;  %v165_v25 = vadd.f32 %v164_v18, %v162_v14  ;;  %v174_v26 = vmul.f32 %v465_v55, %v465_v55  ;;  %v471_v55 = vld [vmem:[%s774_s1 + $0x78] sm:$0xff] }
  0x14   :  { %v27_v27 = vadd.f32 %v26_v19, %v25_v11  ;;  %v62_v28 = vrot.slane %v61_v20, 1  ;;  %v120_v29 = vadd.f32 %v119_v21, %v118_v13  ;;  %v175_v30 = vmul.f32 %v466_v56, %v466_v56  ;;  %v472_v19 = vld [vmem:[%s774_s1 + $0x80] sm:$0xff] }
  0x15   :  { %v49_v31 = vrot.slane %v48_v23, 1  ;;  %v108_v32 = vrot.slane %v107_v24, 2  ;;  %v166_v33 = vadd.f32 %v165_v25, %v163_v17  ;;  %v176_v34 = vmul.f32 %v467_v60, %v467_v60 }
  0x16   :  { %v28_v35 = vsub.f32 1.0, %v27_v27  ;;  %v63_v36 = vadd.f32 %v62_v28, %v61_v20  ;;  %v121_v37 = vrot.slane %v120_v29, 2  ;;  %v177_v38 = vadd.f32 %v174_v26, %v173_v22  ;;  %v473_v20 = vld [vmem:[%s774_s1 + $0x88] sm:$0xff] }
  0x17   :  { %v109_v40 = vadd.f32 %v108_v32, %v107_v24  ;;  %v167_v41 = vrot.slane %v166_v33, 4  ;;  %v217_v42 = vsub.f32 %v468_v39, %v544_v0  ;;  %v50_v48 = vadd.f32 %v49_v31, %v48_v23  ;;  %v474_v23 = vld [vmem:[%s774_s1 + $0x90] sm:$0xff] }
  0x18   :  { %v621_v43 = vmax.f32 %v28_v35, 1e-05  ;;  %v64_v44 = vsub.f32 1.0, %v63_v36  ;;  %v122_v45 = vadd.f32 %v121_v37, %v120_v29  ;;  %v178_v46 = vadd.f32 %v177_v38, %v175_v30  ;;  %v475_v29 = vld [vmem:[%s774_s1 + $0x98] sm:$0xff] }
  0x19   :  { %v168_v49 = vadd.f32 %v167_v41, %v166_v33  ;;  %v218_v51 = vsub.f32 %v469_v47, %v549_v1  ;;  %v219_v56 = vsub.f32 %v470_v50, %v554_v2  ;;  %v110_v57 = vrot.slane %v109_v40, 1 }
  0x1a   :  { %v65_v52 = vmax.f32 %v64_v44, 1e-05  ;;  %v123_v53 = vrot.slane %v122_v45, 1  ;;  %v179_v54 = vadd.f32 %v178_v46, %v176_v34  ;;  %v220_v59 = vsub.f32 %v471_v55, %v559_v3 }
  0x1b   :  { %v169_v58 = vrot.slane %v168_v49, 2  ;;  %v221_v60 = vmul.f32 %v217_v42, %v217_v42  ;;  %v222_v4 = vmul.f32 %v218_v51, %v218_v51  ;;  %v66_v5 = vmul.f32 2.0, %v50_v48 }
  0x1c   :  { %v67_v61 = vmul.f32 %v65_v52, %v621_v43  ;;  %v124_v62 = vadd.f32 %v123_v53, %v122_v45  ;;  %v180_v63 = vrot.slane %v179_v54, 4  ;;  %v223_v6 = vmul.f32 %v219_v56, %v219_v56 }
  0x1d   :  { %v224_v7 = vmul.f32 %v220_v59, %v220_v59  ;;  %v225_v10 = vadd.f32 %v222_v4, %v221_v60  ;;  %v111_v11 = vadd.f32 %v110_v57, %v109_v40  ;;  %v234_v12 = vmul.f32 %v468_v39, %v468_v39 }
  0x1e   :  { %484 = vrcp.f32 %v67_v61  ;;  %v125_v8 = vsub.f32 1.0, %v124_v62  ;;  %v181_v9 = vadd.f32 %v180_v63, %v179_v54  ;;  %v235_v13 = vmul.f32 %v469_v47, %v469_v47 }
  0x1f   :  { %v236_v14 = vmul.f32 %v470_v50, %v470_v50  ;;  %v170_v16 = vadd.f32 %v169_v58, %v168_v49  ;;  %v226_v18 = vadd.f32 %v225_v10, %v223_v6  ;;  %v237_v21 = vmul.f32 %v471_v55, %v471_v55  ;;  %v476_v10 = vld [vmem:[%s774_s1 + $0xa0] sm:$0xff] }
  0x20   :  { %v126_v15 = vmax.f32 %v125_v8, 1e-05  ;;  %v182_v17 = vrot.slane %v181_v9, 2  ;;  %v238_v22 = vadd.f32 %v235_v13, %v234_v12  ;;  %v278_v24 = vsub.f32 %v472_v19, %v544_v0 }
  0x21   :  { %v279_v25 = vsub.f32 %v473_v20, %v549_v1  ;;  %v227_v28 = vadd.f32 %v226_v18, %v224_v7  ;;  %v280_v30 = vsub.f32 %v474_v23, %v554_v2  ;;  %v127_v31 = vmul.f32 2.0, %v111_v11  ;;  %v477_v11 = vld [vmem:[%s774_s1 + $0xa8] sm:$0xff] }
  0x22   :  { %v128_v26 = vmul.f32 %v126_v15, %v621_v43  ;;  %v183_v27 = vadd.f32 %v182_v17, %v181_v9  ;;  %v239_v32 = vadd.f32 %v238_v22, %v236_v14  ;;  %v281_v33 = vsub.f32 %v475_v29, %v559_v3 }
  0x23   :  { %v282_v34 = vmul.f32 %v278_v24, %v278_v24  ;;  %v228_v37 = vrot.slane %v227_v28, 4  ;;  %v283_v38 = vmul.f32 %v279_v25, %v279_v25  ;;  %v171_v40 = vrot.slane %v170_v16, 1  ;;  %v479_v24 = vld [vmem:[%s774_s1 + $0xb8] sm:$0xff] }
  0x24   :  { %v485_v35 = vpop.eup %484  ;;  %486 = vrcp.f32 %v128_v26  ;;  %v184_v36 = vrot.slane %v183_v27, 1  ;;  %v240_v41 = vadd.f32 %v239_v32, %v237_v21  ;;  %v284_v42 = vmul.f32 %v280_v30, %v280_v30 }
  0x25   :  { %v69_v39 = vmul.f32 %v485_v35, %v66_v5  ;;  %v285_v45 = vmul.f32 %v281_v33, %v281_v33  ;;  %v286_v46 = vadd.f32 %v283_v38, %v282_v34  ;;  %v295_v47 = vmul.f32 %v472_v19, %v472_v19 }
  0x26   :  { %v185_v44 = vadd.f32 %v184_v36, %v183_v27  ;;  %v241_v49 = vrot.slane %v240_v41, 4  ;;  %v296_v50 = vmul.f32 %v473_v20, %v473_v20  ;;  %v297_v51 = vmul.f32 %v474_v23, %v474_v23 }
  0x27   :  { %v70_v48 = vmax.f32 %v69_v39, 1e-05  ;;  %v229_v53 = vadd.f32 %v228_v37, %v227_v28  ;;  %v287_v54 = vadd.f32 %v286_v46, %v284_v42  ;;  %v172_v59 = vadd.f32 %v171_v40, %v170_v16  ;;  %v478_v16 = vld [vmem:[%s774_s1 + $0xb0] sm:$0xff] }
  0x28   :  { %v186_v52 = vsub.f32 1.0, %v185_v44  ;;  %v242_v56 = vadd.f32 %v241_v49, %v240_v41  ;;  %v299_v57 = vadd.f32 %v296_v50, %v295_v47  ;;  %v298_v62 = vmul.f32 %v475_v29, %v475_v29 }
  0x29   :  { %v72_v55 = vadd.f32 2.0, %v70_v48  ;;  %v288_v61 = vadd.f32 %v287_v54, %v285_v45  ;;  %v230_v8 = vrot.slane %v229_v53, 2  ;;  %v339_v12 = vsub.f32 %v476_v10, %v544_v0 }
  0x2a   :  { %v487_v58 = vpop.eup %486  ;;  %v187_v60 = vmax.f32 %v186_v52, 1e-05  ;;  %v243_v5 = vrot.slane %v242_v56, 2  ;;  %v300_v6 = vadd.f32 %v299_v57, %v297_v51  ;;  %v340_v13 = vsub.f32 %v477_v11, %v549_v1 }
  0x2b   :  { %v653_v63 = vmul.f32 %v72_v55, %v70_v48  ;;  %v130_v4 = vmul.f32 %v487_v58, %v127_v31  ;;  %v289_v9 = vrot.slane %v288_v61, 4  ;;  %v188_v17 = vmul.f32 2.0, %v172_v59 }
  0x2c   :  { %v189_v7 = vmul.f32 %v187_v60, %v621_v43  ;;  %v244_v15 = vadd.f32 %v243_v5, %v242_v56  ;;  %v301_v18 = vadd.f32 %v300_v6, %v298_v62  ;;  %v341_v19 = vsub.f32 %v478_v16, %v554_v2  ;;  %v480_v6 = vld [vmem:[%s774_s1 + $0xc0] sm:$0xff] }
  0x2d   :  { %488 = vrsqrt.f32 %v653_v63  ;;  %v131_v14 = vmax.f32 %v130_v4, 1e-05  ;;  %v231_v21 = vadd.f32 %v230_v8, %v229_v53  ;;  %v290_v23 = vadd.f32 %v289_v9, %v288_v61 }
  0x2e   :  { %490 = vrcp.f32 %v189_v7  ;;  %v245_v22 = vrot.slane %v244_v15, 1  ;;  %v302_v25 = vrot.slane %v301_v18, 4  ;;  %v342_v26 = vsub.f32 %v479_v24, %v559_v3 }
  0x2f   :  { %v133_v20 = vadd.f32 2.0, %v131_v14  ;;  %v343_v27 = vmul.f32 %v339_v12, %v339_v12  ;;  %v344_v28 = vmul.f32 %v340_v13, %v340_v13  ;;  %v345_v31 = vmul.f32 %v341_v19, %v341_v19 }
  0x30   :  { %v246_v30 = vadd.f32 %v245_v22, %v244_v15  ;;  %v675_v33 = vadd.f32 1.0, %v70_v48  ;;  %v303_v34 = vadd.f32 %v302_v25, %v301_v18  ;;  %v232_v38 = vrot.slane %v231_v21, 1 }
  0x31   :  { %v673_v29 = vmul.f32 %v133_v20, %v131_v14  ;;  %v347_v35 = vadd.f32 %v344_v28, %v343_v27  ;;  %v291_v39 = vrot.slane %v290_v23, 2  ;;  %vm81_vm0 = vcmp.eq.f32.partialorder %v653_v63, inf }
  0x32   :  { %v247_v41 = vsub.f32 1.0, %v246_v30  ;;  %v346_v42 = vmul.f32 %v342_v26, %v342_v26  ;;  %v356_v44 = vmul.f32 %v476_v10, %v476_v10  ;;  %v304_v46 = vrot.slane %v303_v34, 2 }
  0x33   :  { %v489_v32 = vpop.eup %488  ;;  %492 = vrsqrt.f32 %v673_v29  ;;  %v348_v47 = vadd.f32 %v347_v35, %v345_v31  ;;  %v357_v48 = vmul.f32 %v477_v11, %v477_v11  ;;  %vm83_vm1 = vcmp.eq.f32.partialorder %v653_v63, 0.0 }
  0x34   :  { %v491_v36 = vpop.eup %490  ;;  %v75_v37 = vmul.f32 %v489_v32, %v653_v63  ;;  %v84_v49 = vand.u32 2147483648, %v653_v63  ;;  %v248_v51 = vmax.f32 %v247_v41, 1e-05  ;;  %v233_v53 = vadd.f32 %v232_v38, %v231_v21  ;;  %v481_v21 = vld [vmem:[%s774_s1 + $0xc8] sm:$0xff] }
  0x35   :  { %v191_v40 = vmul.f32 %v491_v36, %v188_v17  ;;  %v305_v54 = vadd.f32 %v304_v46, %v303_v34  ;;  %v358_v55 = vmul.f32 %v478_v16, %v478_v16  ;;  %v292_v58 = vadd.f32 %v291_v39, %v290_v23  ;;  %v483_v23 = vld [vmem:[%s774_s1 + $0xd8] sm:$0xff] }
  0x36   :  { %v76_v45 = vmul.f32 %v489_v32, %v75_v37  ;;  %v250_v57 = vmul.f32 %v248_v51, %v621_v43  ;;  %v349_v59 = vadd.f32 %v348_v47, %v346_v42  ;;  %v359_v4 = vmul.f32 %v479_v24, %v479_v24 }
  0x37   :  { %v682_v50 = vmax.f32 %v191_v40, 1e-05  ;;  %v306_v62 = vrot.slane %v305_v54, 1  ;;  %v360_v5 = vadd.f32 %v357_v48, %v356_v44  ;;  %v400_v9 = vsub.f32 %v480_v6, %v544_v0  ;;  %v482_v0 = vld [vmem:[%s774_s1 + $0xd0] sm:$0xff] }
  0x38   :  { %v77_v52 = vmul.f32 0.5, %v76_v45  ;;  %494 = vrcp.f32 %v250_v57  ;;  %v132_v11 = vadd.f32 1.0, %v131_v14  ;;  %v249_v16 = vmul.f32 2.0, %v233_v53 }
  0x39   :  { %v194_v56 = vadd.f32 2.0, %v682_v50  ;;  %v493_v60 = vpop.eup %492  ;;  %v307_v12 = vadd.f32 %v306_v62, %v305_v54  ;;  %v361_v13 = vadd.f32 %v360_v5, %v358_v55  ;;  %v293_v17 = vrot.slane %v292_v58, 1 }
  0x3a   :  { %v78_v61 = vsub.f32 1.5, %v77_v52  ;;  %v136_v7 = vmul.f32 %v493_v60, %v673_v29  ;;  %vm142_vm2 = vcmp.eq.f32.partialorder %v673_v29, inf  ;;  %v350_v20 = vrot.slane %v349_v59, 4 }
  0x3b   :  { %v691_v8 = vmul.f32 %v194_v56, %v682_v50  ;;  %v308_v19 = vsub.f32 1.0, %v307_v12  ;;  %v362_v22 = vadd.f32 %v361_v13, %v359_v4  ;;  %v401_v24 = vsub.f32 %v481_v21, %v549_v1 }
  0x3c   :  { %v79_v10 = vmul.f32 %v489_v32, %v78_v61  ;;  %v137_v15 = vmul.f32 %v493_v60, %v136_v7  ;;  %v402_v25 = vsub.f32 %v482_v0, %v554_v2  ;;  %vm144_vm3 = vcmp.eq.f32.partialorder %v673_v29, 0.0 }
  0x3d   :  { %496 = vrsqrt.f32 %v691_v8  ;;  %v309_v27 = vmax.f32 %v308_v19, 1e-05  ;;  %v403_v28 = vsub.f32 %v483_v23, %v559_v3  ;;  %v294_v34 = vadd.f32 %v293_v17, %v292_v58 }
  0x3e   :  { %v80_v18 = vmul.f32 %v79_v10, %v653_v63  ;;  %v138_v14 = vmul.f32 0.5, %v137_v15  ;;  %v495_v30 = vpop.eup %494  ;;  %v363_v35 = vrot.slane %v362_v22, 4  ;;  %v351_v37 = vadd.f32 %v350_v20, %v349_v59 }
  0x3f   :  { %v252_v36 = vmul.f32 %v495_v30, %v249_v16  ;;  %v311_v2 = vmul.f32 %v309_v27, %v621_v43  ;;  %v404_v41 = vmul.f32 %v400_v9, %v400_v9  ;;  %v405_v42 = vmul.f32 %v401_v24, %v401_v24 }
  0x40   :  { %v82_v26 = vsel %vm81_vm0, %v653_v63, %v80_v18  ;;  %v139_v32 = vsub.f32 1.5, %v138_v14  ;;  %v364_v40 = vadd.f32 %v363_v35, %v362_v22  ;;  %v145_v3 = vand.u32 2147483648, %v673_v29 }
  0x41   :  { %v85_v31 = vsel %vm83_vm1, %v84_v49, %v82_v26  ;;  %v719_v44 = vmax.f32 %v252_v36, 1e-05  ;;  %v406_v46 = vmul.f32 %v402_v25, %v402_v25  ;;  %v310_v49 = vmul.f32 2.0, %v294_v34 }
  0x42   :  { %v86_v1 = vadd.f32 %v85_v31, %v675_v33  ;;  %v140_v39 = vmul.f32 %v493_v60, %v139_v32  ;;  %v365_v33 = vrot.slane %v364_v40, 2  ;;  %v352_v51 = vrot.slane %v351_v37, 2 }
  0x43   :  { %v497_v38 = vpop.eup %496  ;;  %v255_v48 = vadd.f32 2.0, %v719_v44  ;;  %v407_v54 = vmul.f32 %v403_v28, %v403_v28  ;;  %v408_v55 = vadd.f32 %v405_v42, %v404_v41  ;;  %v417_v59 = vmul.f32 %v480_v6, %v480_v6 }
  0x44   :  { %498 = vlog2.f32 %v86_v1  ;;  %v197_v63 = vmul.f32 %v497_v38, %v691_v8  ;;  %v141_v45 = vmul.f32 %v140_v39, %v673_v29  ;;  %v366_v53 = vadd.f32 %v365_v33, %v364_v40 }
  0x45   :  { %500 = vrcp.f32 %v311_v2  ;;  %v729_v58 = vmul.f32 %v255_v48, %v719_v44  ;;  %v409_v62 = vadd.f32 %v408_v55, %v406_v46  ;;  %v418_v4 = vmul.f32 %v481_v21, %v481_v21 }
  0x46   :  { %v198_v47 = vmul.f32 %v497_v38, %v197_v63  ;;  %v143_v52 = vsel %vm142_vm2, %v673_v29, %v141_v45  ;;  %v367_v61 = vrot.slane %v366_v53, 1  ;;  %v193_v7 = vadd.f32 1.0, %v682_v50 }
  0x47   :  { %v146_v56 = vsel %vm144_vm3, %v145_v3, %v143_v52  ;;  %502 = vrsqrt.f32 %v729_v58  ;;  %v353_v10 = vadd.f32 %v352_v51, %v351_v37  ;;  %v419_v15 = vmul.f32 %v482_v0, %v482_v0 }
  0x48   :  { %v199_v57 = vmul.f32 0.5, %v198_v47  ;;  %v147_v60 = vadd.f32 %v146_v56, %v132_v11  ;;  %v368_v29 = vadd.f32 %v367_v61, %v366_v53  ;;  %vm203_vm4 = vcmp.eq.f32.partialorder %v691_v8, inf }
  0x49   :  { %v410_v11 = vadd.f32 %v409_v62, %v407_v54  ;;  %v206_v50 = vand.u32 2147483648, %v691_v8  ;;  %v420_v18 = vmul.f32 %v483_v23, %v483_v23  ;;  %v421_v19 = vadd.f32 %v418_v4, %v417_v59 }
  0x4a   :  { %v499_v5 = vpop.eup %498  ;;  %v200_v9 = vsub.f32 1.5, %v199_v57  ;;  %504 = vlog2.f32 %v147_v60  ;;  %v369_v17 = vsub.f32 1.0, %v368_v29  ;;  %vm205_vm5 = vcmp.eq.f32.partialorder %v691_v8, 0.0 }
  0x4b   :  { %v501_v12 = vpop.eup %500  ;;  %v88_v13 = vmul.f32 0.6931472, %v499_v5  ;;  %v354_v0 = vrot.slane %v353_v10, 1  ;;  %v422_v22 = vadd.f32 %v421_v19, %v419_v15  ;;  %v411_v27 = vrot.slane %v410_v11, 4 }
  0x4c   :  { %v201_v16 = vmul.f32 %v497_v38, %v200_v9  ;;  %v313_v6 = vmul.f32 %v501_v12, %v310_v49  ;;  %v370_v14 = vmax.f32 %v369_v17, 1e-05  ;;  %v254_v47 = vadd.f32 1.0, %v719_v44 }
  0x4d   :  { %89 = vst [vmem:[%s775_s2] sm:$0x1] %v88_v13  ;;  %v503_v24 = vpop.eup %502  ;;  %v423_v32 = vadd.f32 %v422_v22, %v420_v18  ;;  %v355_v36 = vadd.f32 %v354_v0, %v353_v10  ;;  %vm264_vm6 = vcmp.eq.f32.partialorder %v729_v58, inf  ;;  %v267_v48 = vand.u32 2147483648, %v729_v58 }
  0x4e   :  { %v202_v20 = vmul.f32 %v201_v16, %v691_v8  ;;  %v740_v21 = vmax.f32 %v313_v6, 1e-05  ;;  %v258_v23 = vmul.f32 %v503_v24, %v729_v58  ;;  %v372_v31 = vmul.f32 %v370_v14, %v621_v43 }
  0x4f   :  { %v424_v37 = vrot.slane %v423_v32, 4  ;;  %v371_v40 = vmul.f32 2.0, %v355_v36  ;;  %vm266_vm7 = vcmp.eq.f32.partialorder %v729_v58, 0.0 }
  0x50   :  { %v204_v25 = vsel %vm203_vm4, %v691_v8, %v202_v20  ;;  %v316_v26 = vadd.f32 2.0, %v740_v21  ;;  %v505_v28 = vpop.eup %504  ;;  %v259_v2 = vmul.f32 %v503_v24, %v258_v23  ;;  %506 = vrcp.f32 %v372_v31 }
  0x51   :  { %v207_v30 = vsel %vm205_vm5, %v206_v50, %v204_v25  ;;  %v149_v34 = vmul.f32 0.6931472, %v505_v28  ;;  %v412_v8 = vadd.f32 %v411_v27, %v410_v11  ;;  %v425_v39 = vadd.f32 %v424_v37, %v423_v32 }
  0x52   :  { %v208_v35 = vadd.f32 %v207_v30, %v193_v7  ;;  %v317_v1 = vmul.f32 %v316_v26, %v740_v21  ;;  %v260_v38 = vmul.f32 0.5, %v259_v2 }
  0x53   :  { %150 = vst [vmem:[%s775_s2 + $0x1] sm:$0x1] %v149_v34  ;;  %v426_v42 = vrot.slane %v425_v39, 2  ;;  %v413_v3 = vrot.slane %v412_v8, 2 }
  0x54   :  { %508 = vlog2.f32 %v208_v35  ;;  %v261_v41 = vsub.f32 1.5, %v260_v38  ;;  %vm325_vm8 = vcmp.eq.f32.partialorder %v317_v1, inf  ;;  %v328_v6 = vand.u32 2147483648, %v317_v1 }
  0x55   :  { %510 = vrsqrt.f32 %v317_v1  ;;  %v427_v33 = vadd.f32 %v426_v42, %v425_v39  ;;  %v414_v57 = vadd.f32 %v413_v3, %v412_v8  ;;  %vm327_vm9 = vcmp.eq.f32.partialorder %v317_v1, 0.0 }
  0x56   :  { %v507_v63 = vpop.eup %506  ;;  %v262_v45 = vmul.f32 %v503_v24, %v261_v41 }
  0x57   :  { %v374_v49 = vmul.f32 %v507_v63, %v371_v40  ;;  %v428_v54 = vrot.slane %v427_v33, 1  ;;  %v415_v10 = vrot.slane %v414_v57, 1 }
  0x58   :  { %v263_v53 = vmul.f32 %v262_v45, %v729_v58 }
  0x59   :  { %v375_v56 = vmax.f32 %v374_v49, 1e-05  ;;  %v429_v59 = vadd.f32 %v428_v54, %v427_v33  ;;  %v416_v16 = vadd.f32 %v415_v10, %v414_v57 }
  0x5a   :  { %v509_v46 = vpop.eup %508  ;;  %v265_v44 = vsel %vm264_vm6, %v729_v58, %v263_v53  ;;  %v315_v58 = vadd.f32 1.0, %v740_v21 }
  0x5b   :  { %v511_v51 = vpop.eup %510  ;;  %v210_v52 = vmul.f32 0.6931472, %v509_v46  ;;  %v268_v60 = vsel %vm266_vm7, %v267_v48, %v265_v44  ;;  %v377_v62 = vadd.f32 2.0, %v375_v56  ;;  %v430_v5 = vsub.f32 1.0, %v429_v59 }
  0x5c   :  { %v319_v55 = vmul.f32 %v511_v51, %v317_v1  ;;  %v269_v4 = vadd.f32 %v268_v60, %v254_v47  ;;  %v432_v20 = vmul.f32 2.0, %v416_v16  ;;  %v376_v35 = vadd.f32 1.0, %v375_v56 }
  0x5d   :  { %211 = vst [vmem:[%s775_s2 + $0x2] sm:$0x1] %v210_v52  ;;  %v378_v9 = vmul.f32 %v377_v62, %v375_v56  ;;  %v431_v12 = vmax.f32 %v430_v5, 1e-05 }
  0x5e   :  { %v320_v61 = vmul.f32 %v511_v51, %v319_v55  ;;  %512 = vlog2.f32 %v269_v4 }
  0x5f   :  { %514 = vrsqrt.f32 %v378_v9  ;;  %v433_v29 = vmul.f32 %v431_v12, %v621_v43  ;;  %vm386_vm10 = vcmp.eq.f32.partialorder %v378_v9, inf  ;;  %v389_v31 = vand.u32 2147483648, %v378_v9 }
  0x60   :  { %v321_v7 = vmul.f32 0.5, %v320_v61  ;;  %vm388_vm11 = vcmp.eq.f32.partialorder %v378_v9, 0.0 }
  0x61   :  { %516 = vrcp.f32 %v433_v29 }
  0x62   :  { %v322_v13 = vsub.f32 1.5, %v321_v7 }
  0x64   :  { %v323_v15 = vmul.f32 %v511_v51, %v322_v13  ;;  %v513_v50 = vpop.eup %512 }
  0x65   :  { %v515_v17 = vpop.eup %514  ;;  %v271_v18 = vmul.f32 0.6931472, %v513_v50 }
  0x66   :  { %v324_v11 = vmul.f32 %v323_v15, %v317_v1  ;;  %v380_v14 = vmul.f32 %v515_v17, %v378_v9 }
  0x67   :  { %272 = vst [vmem:[%s775_s2 + $0x3] sm:$0x1] %v271_v18  ;;  %v517_v22 = vpop.eup %516 }
  0x68   :  { %v326_v19 = vsel %vm325_vm8, %v317_v1, %v324_v11  ;;  %v381_v24 = vmul.f32 %v515_v17, %v380_v14  ;;  %v435_v25 = vmul.f32 %v517_v22, %v432_v20 }
  0x69   :  { %v329_v0 = vsel %vm327_vm9, %v328_v6, %v326_v19 }
  0x6a   :  { %v330_v43 = vadd.f32 %v329_v0, %v315_v58  ;;  %v382_v26 = vmul.f32 0.5, %v381_v24  ;;  %v436_v21 = vmax.f32 %v435_v25, 1e-05 }
  0x6c   :  { %518 = vlog2.f32 %v330_v43  ;;  %v383_v27 = vsub.f32 1.5, %v382_v26  ;;  %v438_v28 = vadd.f32 2.0, %v436_v21  ;;  %v437_v33 = vadd.f32 1.0, %v436_v21 }
  0x6e   :  { %v384_v30 = vmul.f32 %v515_v17, %v383_v27  ;;  %v439_v32 = vmul.f32 %v438_v28, %v436_v21 }
  0x70   :  { %v385_v1 = vmul.f32 %v384_v30, %v378_v9  ;;  %520 = vrsqrt.f32 %v439_v32  ;;  %vm447_vm12 = vcmp.eq.f32.partialorder %v439_v32, inf  ;;  %v450_v45 = vand.u32 2147483648, %v439_v32 }
  0x71   :  { %vm449_vm13 = vcmp.eq.f32.partialorder %v439_v32, 0.0 }
  0x72   :  { %v519_v23 = vpop.eup %518  ;;  %v387_v36 = vsel %vm386_vm10, %v378_v9, %v385_v1 }
  0x73   :  { %v332_v34 = vmul.f32 0.6931472, %v519_v23  ;;  %v390_v2 = vsel %vm388_vm11, %v389_v31, %v387_v36 }
  0x74   :  { %v391_v37 = vadd.f32 %v390_v2, %v376_v35 }
  0x75   :  { %333 = vst [vmem:[%s775_s2 + $0x4] sm:$0x1] %v332_v34 }
  0x76   :  { %522 = vlog2.f32 %v391_v37  ;;  %v521_v8 = vpop.eup %520 }
  0x77   :  { %v441_v38 = vmul.f32 %v521_v8, %v439_v32 }
  0x79   :  { %v442_v39 = vmul.f32 %v521_v8, %v441_v38 }
  0x7b   :  { %v443_v41 = vmul.f32 0.5, %v442_v39 }
  0x7c   :  { %v523_v40 = vpop.eup %522 }
  0x7d   :  { %v393_v42 = vmul.f32 0.6931472, %v523_v40  ;;  %v444_v3 = vsub.f32 1.5, %v443_v41 }
  0x7f   :  { %394 = vst [vmem:[%s775_s2 + $0x5] sm:$0x1] %v393_v42  ;;  %v445_v63 = vmul.f32 %v521_v8, %v444_v3 }
  0x81   :  { %v446_v46 = vmul.f32 %v445_v63, %v439_v32 }
  0x83   :  { %v448_v47 = vsel %vm447_vm12, %v439_v32, %v446_v46 }
  0x84   :  { %v451_v48 = vsel %vm449_vm13, %v450_v45, %v448_v47 }
  0x85   :  { %v452_v49 = vadd.f32 %v451_v48, %v437_v33 }
  0x87   :  { %524 = vlog2.f32 %v452_v49 }
  0x8d   :  { %v525_v51 = vpop.eup %524 }
  0x8e   :  { %v454_v52 = vmul.f32 0.6931472, %v525_v51 }
  0x90   :  { %455 = vst [vmem:[%s775_s2 + $0x6] sm:$0x1] %v454_v52 }

</bundles_post_ra>
